<compile_context>
chip_gen: v7x
topology: tpu7x:2x2x1
jax: 0.10.0
libtpu: 0.0.40
codegen_flags: <defaults>
</compile_context>

<pallas_src>
import jax
import jax.numpy as jnp
from jax.experimental import pallas as pl
from jax.experimental.pallas import tpu as pltpu


def _identity_dma_kernel(x_hbm, o_hbm, sem):
    # Single HBM->HBM DMA: no HBM->VMEM->vreg->VMEM->HBM transit, no vld/vst
    # bundle work, no grid-step overhead. Correct on v5e / v6e / v7x.
    cp = pltpu.make_async_copy(x_hbm, o_hbm, sem)
    cp.start()
    cp.wait()


def identity_pallas(x):
    """Materializing identity: one HBM->HBM DMA through a Pallas kernel."""
    if x.size == 0:
        # Zero-byte DMA is pointless; the no-op is exact.
        return x
    return pl.pallas_call(
        _identity_dma_kernel,
        out_shape=jax.ShapeDtypeStruct(x.shape, x.dtype),
        in_specs=[pl.BlockSpec(memory_space=pl.ANY)],   # raw HBM ref, no auto-DMA
        out_specs=pl.BlockSpec(memory_space=pl.ANY),    # raw HBM ref, no auto-DMA
        scratch_shapes=[pltpu.SemaphoreType.DMA(())],
    )(x)


def identity_forward(*inputs):
    """Matches Identity.forward: one arg -> that arg, many args -> tuple.

    An identity has zero required HBM traffic, so this is a pure pass-through
    (alias semantics, same as the PyTorch module returning its input tensor).
    Use `identity_pallas` if a fresh buffer must be materialized.
    """
    if len(inputs) == 1:
        return inputs[0]
    return tuple(inputs)


if __name__ == "__main__":
    key = jax.random.PRNGKey(0)
    k1, k2, k3 = jax.random.split(key, 3)

    # Shapes consistent with a generic activation tensor in the module.
    x = jax.random.normal(k1, (2, 4, 16, 16), dtype=jnp.float32)

    # 1) Faithful forward path: zero-cost pass-through (what the review asks for).
    y = jax.block_until_ready(identity_forward(x))
    assert y.shape == x.shape and y.dtype == x.dtype
    assert bool(jnp.all(y == x))

    # 2) Pallas kernel path: single HBM->HBM DMA, bit-exact copy.
    y_k = jax.block_until_ready(identity_pallas(x))
    assert y_k.shape == x.shape and y_k.dtype == x.dtype
    assert bool(jnp.all(y_k == x))

    # Awkward (non-tile-aligned) size: raw DMA copy needs no padding at all.
    x3 = jax.random.normal(k3, (17, 100), dtype=jnp.float32)
    y3 = jax.block_until_ready(identity_pallas(x3))
    assert y3.shape == x3.shape and bool(jnp.all(y3 == x3))

    # Multi-input path (returns a tuple, like the PyTorch module).
    x2 = jax.random.normal(k2, (2, 8), dtype=jnp.float32)
    outs = jax.block_until_ready(identity_forward(x, x2))
    assert isinstance(outs, tuple) and len(outs) == 2
    assert bool(jnp.all(outs[0] == x)) and bool(jnp.all(outs[1] == x2))

    print("KERNEL_OK")
</pallas_src>

<mosaic_0001>
module attributes {stable_mosaic.version = 11 : i64} {
  func.func @_identity_dma_kernel(%arg0: memref<2x4x16x16xf32, #tpu.memory_space<any>>, %arg1: memref<2x4x16x16xf32, #tpu.memory_space<any>>, %arg2: memref<!tpu.dma_semaphore, #tpu.memory_space<semaphore_mem>>) attributes {dimension_semantics = [], scalar_prefetch = 0 : i64, scratch_operands = 1 : i64, tpu.core_type = #tpu.core_type<tc>} {
    tpu.enqueue_dma source(%arg0 : memref<2x4x16x16xf32, #tpu.memory_space<any>>) target(%arg1 : memref<2x4x16x16xf32, #tpu.memory_space<any>>) target_semaphore(%arg2 : memref<!tpu.dma_semaphore, #tpu.memory_space<semaphore_mem>>)
    tpu.wait_dma2 semaphore(%arg2 : memref<!tpu.dma_semaphore, #tpu.memory_space<semaphore_mem>>) src(%arg0 : memref<2x4x16x16xf32, #tpu.memory_space<any>>) dst(%arg1 : memref<2x4x16x16xf32, #tpu.memory_space<any>>)
    return
  }
}

</mosaic_0001>

<bundles_post_ra>
// kernel: tpu_custom_call.1
= control target key start
LH: loop header
LB: loop body
LE: loop exit
PB: predicated region body
PF: predicated region fallthrough
CT: control target
= control target key end

     0   :  { %s36_s6 = smov [#allocation2]   ;;  %s37_s7 = smov [#allocation3]   ;;  %s55_s0 = inlined_call_operand.hbm [shape: f32[2,4,16,16], index: 0, kind: input, shape index: {}]   ;;  %s56_s1 = inlined_call_operand.hbm [shape: f32[2,4,16,16], index: 1, kind: output, shape index: {}]  }
   0x1   :  { %s38_s8 = smov 0  }
   0x2   :  { %18 = dma.general %s55_s0, 2048, %s56_s1, %s36_s6, %s37_s7, [#allocation4], %s38_s8, 0  }
   0x3   :  { %34 = dma.done.wait [#allocation2], 2048 }
   0x4   :  { %35 = vsyncadd [#allocation2], 4294965248 }
   0x5   :  { %24 = vsyncmov [#allocation2] }
   0x8   :  { %s25_s13 = vpop.sfrf %24 }
   0x9   :  { %p30_p0 = scmp.ne.s32.totalorder %s25_s13, 0 }
   0xb   :  { %29 = shalt.err (%p30_p0)  }

</bundles_post_ra>
